<compile_context>
chip_gen: v6e
topology: v6e:2x2x1
jax: 0.10.0
libtpu: 0.0.40
codegen_flags: <defaults>
</compile_context>

<pallas_src>
import functools

import jax
import jax.numpy as jnp
from jax import lax
from jax.experimental import pallas as pl
from jax.experimental.pallas import tpu as pltpu


# ----------------------------------------------------------------------------
# Fused Pallas kernel: all conv layers + activations in one body.
# ----------------------------------------------------------------------------
def _fused_decoder_kernel(x_ref, *rest, K, L, pad, n_layers, apply_act,
                          compute_dtype):
    # rest = (w_0, b_0, ..., w_{n-1}, b_{n-1}, o_ref, act_scratch)
    param_refs = rest[:2 * n_layers]       # w_i: (K, Cout_i, Cin_i), b_i: (Cout_i, 1) f32
    o_ref = rest[2 * n_layers]             # (Cout_last, NB*L)  lane-dense (batch in lanes)
    pad_ref = rest[2 * n_layers + 1]       # VMEM scratch (Cmax, NB*L + 2*pad), compute_dtype

    NL = x_ref.shape[-1]                   # NB * L lanes in this block

    # Per-tap per-sample boundary masks, hoisted once for the whole layer stack.
    # mask_k[lane] == True  iff  (lane mod L) + (k - pad) is a valid position,
    # i.e. the tap does not read across a sample boundary (or into the
    # never-initialized scratch halo).  Tap k == pad needs no mask.
    lane = lax.broadcasted_iota(jnp.int32, (1, NL), 1) % L
    masks = []
    for k in range(K):
        d = k - pad
        masks.append(None if d == 0 else ((lane + d >= 0) & (lane + d < L)))

    cur = x_ref[...].astype(jnp.float32)   # (C0, NL): whole batch tile at once
    for i in range(n_layers):
        w_ref = param_refs[2 * i]          # (K, Cout, Cin) ref
        b = param_refs[2 * i + 1][...]     # (Cout, 1) f32, loaded/broadcast once per layer
        cin = cur.shape[0]

        # One lane-offset store of the whole activation tile (rows above `cin`
        # and the 2*pad halo columns are never read for this layer, so they can
        # hold stale/garbage data -- the masks below zero every lane that would
        # otherwise see it).
        pad_ref[0:cin, pad:pad + NL] = cur.astype(compute_dtype)

        # K accumulated per-tap sub-matmuls: no im2col concatenate materialized.
        acc = None
        for k in range(K):
            xs = pad_ref[0:cin, k:k + NL]                  # shifted view (Cin, NL)
            if masks[k] is not None:
                xs = jnp.where(masks[k], xs, jnp.zeros_like(xs))
            part = jnp.dot(w_ref[k], xs, preferred_element_type=jnp.float32)
            acc = part if acc is None else acc + part

        cur = acc + b                      # f32 bias add
        if apply_act[i]:                   # activation_fn = ReLU (as in the script)
            cur = jnp.maximum(cur, 0.0)

    o_ref[...] = cur.astype(o_ref.dtype)


# ----------------------------------------------------------------------------
# Parameters (PyTorch layout) + one-time kernel-layout preparation
# ----------------------------------------------------------------------------
def init_decoder_params(key, latent_dim, conv_filters, output_features, K):
    # Channel path mirrors the PyTorch module:
    #   latent_dim -> reversed(conv_filters)... -> output_features
    chans = [latent_dim] + list(reversed(conv_filters)) + [output_features]
    params = []
    for cin, cout in zip(chans[:-1], chans[1:]):
        key, kw, kb = jax.random.split(key, 3)
        bound = 1.0 / float(cin * K) ** 0.5          # PyTorch Conv1d default bound
        W = jax.random.uniform(kw, (cout, cin, K), jnp.float32, -bound, bound)
        b = jax.random.uniform(kb, (cout,), jnp.float32, -bound, bound)
        params.append((W, b))
    return params


def prepare_kernel_params(params, compute_dtype):
    """Per-layer weight as (K, Cout, Cin) (tap-leading, so w_ref[k] is a clean
    sublane-aligned load in the kernel) + bias as an f32 (Cout, 1) column."""
    flat = []
    for (W, b) in params:
        cout, _, _ = W.shape
        flat.append(jnp.transpose(W, (2, 0, 1)).astype(compute_dtype))  # (K, O, I)
        flat.append(b.reshape(cout, 1).astype(jnp.float32))
    return flat


def _choose_batch_tile(N, L, target_lanes):
    """Largest batch tile NB dividing N with NB*L a multiple of 128 (BlockSpec
    lane constraint) and NB*L <= target_lanes; fall back to the full batch
    (block == full array, always legal)."""
    best = N
    for nb in range(1, N):
        if N % nb:
            continue
        lanes = nb * L
        if lanes % 128:
            continue
        if lanes > target_lanes:
            break
        best = nb
    return best


# ----------------------------------------------------------------------------
# Forward pass (single fused pallas_call, NCL in / NCL out)
# ----------------------------------------------------------------------------
def decoder_forward(x_ncl, params, *, compute_dtype=jnp.float32,
                    target_lanes=1024):
    N, C0, L = x_ncl.shape
    K = params[0][0].shape[2]
    # PyTorch Conv1d(padding=(K-1)//2) only keeps the length for odd K.
    assert K % 2 == 1, "even kernel_size changes PyTorch output length semantics"
    pad = (K - 1) // 2
    n_layers = len(params)
    cout_last = params[-1][0].shape[0]
    apply_act = tuple(i < n_layers - 1 for i in range(n_layers))
    # Max input-channel count across layers (activation scratch height).
    cmax = max([C0] + [W.shape[0] for (W, _) in params[:-1]])

    flat = prepare_kernel_params(params, compute_dtype)

    # Lane-dense layout: fold the batch into the lane axis (wrapper-side, once).
    x2 = jnp.transpose(x_ncl, (1, 0, 2)).reshape(C0, N * L)

    nb = _choose_batch_tile(N, L, target_lanes)
    n_blocks = N // nb
    nbl = nb * L

    kernel = functools.partial(
        _fused_decoder_kernel, K=K, L=L, pad=pad, n_layers=n_layers,
        apply_act=apply_act, compute_dtype=compute_dtype)

    # Activation streams over the grid; weights/bias get index_maps that ignore
    # the grid axis (same block every step => resident in VMEM, no re-DMA).
    in_specs = [pl.BlockSpec((C0, nbl), lambda i: (0, i))]
    for a in flat:
        in_specs.append(pl.BlockSpec(a.shape, lambda i, _nd=a.ndim: (0,) * _nd))

    out2 = pl.pallas_call(
        kernel,
        out_shape=jax.ShapeDtypeStruct((cout_last, N * L), x_ncl.dtype),
        grid=(n_blocks,),
        in_specs=in_specs,
        out_specs=pl.BlockSpec((cout_last, nbl), lambda i: (0, i)),
        scratch_shapes=[pltpu.VMEM((cmax, nbl + 2 * pad), compute_dtype)],
        compiler_params=pltpu.CompilerParams(
            dimension_semantics=("parallel",),        # megacore on v7x / pipelining
            vmem_limit_bytes=32 * 1024 * 1024,        # explicit: v5e default is 16 MiB
        ),
    )(x2, *flat)

    # Back to PyTorch NCL.
    return jnp.transpose(out2.reshape(cout_last, N, L), (1, 0, 2))


# ----------------------------------------------------------------------------
# Pure-JAX reference (lax conv) for correctness check.
# ----------------------------------------------------------------------------
def decoder_ref(x_ncl, params):
    x = x_ncl
    n_layers = len(params)
    for i, (W, b) in enumerate(params):
        K = W.shape[2]
        p = (K - 1) // 2
        x = lax.conv_general_dilated(
            x, W, window_strides=(1,), padding=[(p, p)],
            dimension_numbers=("NCH", "OIH", "NCH"))
        x = x + b.reshape(1, -1, 1)
        if i < n_layers - 1:
            x = jnp.maximum(x, 0.0)
    return x


if __name__ == "__main__":
    # Small shapes consistent with the module (activation_fn = nn.ReLU()).
    N, L = 2, 16
    latent_dim = 8
    conv_filters = [16, 32]       # decoder uses reversed(conv_filters) = [32, 16]
    output_features = 6
    kernel_size = 3

    key = jax.random.PRNGKey(0)
    key, kx = jax.random.split(key)
    x = jax.random.normal(kx, (N, latent_dim, L), jnp.float32)   # PyTorch NCL input

    params = init_decoder_params(key, latent_dim, conv_filters,
                                 output_features, kernel_size)

    # f32 MXU operands here so the 1e-5 check against the lax.conv reference
    # holds; pass compute_dtype=jnp.bfloat16 for 2x MXU rate on v6e/v7x (then
    # relax the tolerance accordingly).
    out = jax.block_until_ready(decoder_forward(x, params,
                                                compute_dtype=jnp.float32))
    ref = jax.block_until_ready(decoder_ref(x, params))

    assert out.shape == (N, output_features, L), out.shape
    assert jnp.allclose(out, ref, rtol=1e-5, atol=1e-5), "mismatch vs reference"

    print("KERNEL_OK")
</pallas_src>

<mosaic_0001>
module attributes {stable_mosaic.version = 11 : i64} {
  func.func @_fused_decoder_kernel(%arg0: i32, %arg1: memref<8x32xf32, #tpu.memory_space<vmem>>, %arg2: memref<3x32x8xf32, #tpu.memory_space<vmem>>, %arg3: memref<32x1xf32, #tpu.memory_space<vmem>>, %arg4: memref<3x16x32xf32, #tpu.memory_space<vmem>>, %arg5: memref<16x1xf32, #tpu.memory_space<vmem>>, %arg6: memref<3x6x16xf32, #tpu.memory_space<vmem>>, %arg7: memref<6x1xf32, #tpu.memory_space<vmem>>, %arg8: memref<6x32xf32, #tpu.memory_space<vmem>>, %arg9: memref<32x34xf32, #tpu.memory_space<vmem>>) attributes {dimension_semantics = [#tpu.dimension_semantics<parallel>], iteration_bounds = array<i64: 1>, scalar_prefetch = 0 : i64, scratch_operands = 1 : i64, tpu.core_type = #tpu.core_type<tc>, window_params = [{transform_indices = @transform_0, window_bounds = array<i64: 8, 32>}, {pipeline_mode = #tpu.pipeline_mode<synchronous>, transform_indices = @transform_1, window_bounds = array<i64: 3, 32, 8>}, {pipeline_mode = #tpu.pipeline_mode<synchronous>, transform_indices = @transform_2, window_bounds = array<i64: 32, 1>}, {pipeline_mode = #tpu.pipeline_mode<synchronous>, transform_indices = @transform_3, window_bounds = array<i64: 3, 16, 32>}, {pipeline_mode = #tpu.pipeline_mode<synchronous>, transform_indices = @transform_4, window_bounds = array<i64: 16, 1>}, {pipeline_mode = #tpu.pipeline_mode<synchronous>, transform_indices = @transform_5, window_bounds = array<i64: 3, 6, 16>}, {pipeline_mode = #tpu.pipeline_mode<synchronous>, transform_indices = @transform_6, window_bounds = array<i64: 6, 1>}, {transform_indices = @transform_7, window_bounds = array<i64: 6, 32>}]} {
    %0 = tpu.iota {dimensions = array<i32: 1>} : vector<1x32xi32>
    %c16_i32 = arith.constant 16 : i32
    %c0_i32 = arith.constant 0 : i32
    %1 = arith.cmpi eq, %c16_i32, %c0_i32 : i32
    %c1_i32 = arith.constant 1 : i32
    %2 = arith.select %1, %c1_i32, %c16_i32 : i32
    %3 = vector.broadcast %2 : i32 to vector<1x32xi32>
    %4 = arith.remsi %0, %3 : vector<1x32xi32>
    %c0_i32_0 = arith.constant 0 : i32
    %5 = vector.broadcast %c0_i32_0 : i32 to vector<1x32xi32>
    %6 = arith.cmpi ne, %4, %5 : vector<1x32xi32>
    %c0_i32_1 = arith.constant 0 : i32
    %7 = vector.broadcast %c0_i32_1 : i32 to vector<1x32xi32>
    %8 = arith.cmpi slt, %4, %7 : vector<1x32xi32>
    %c0_i32_2 = arith.constant 0 : i32
    %9 = arith.cmpi slt, %2, %c0_i32_2 : i32
    %10 = vector.broadcast %9 : i1 to vector<1x32xi1>
    %11 = vector.broadcast %10 : vector<1x32xi1> to vector<1x32xi1>
    %12 = arith.xori %8, %11 : vector<1x32xi1>
    %13 = arith.andi %12, %6 : vector<1x32xi1>
    %14 = vector.broadcast %2 : i32 to vector<1x32xi32>
    %15 = arith.addi %4, %14 : vector<1x32xi32>
    %16 = arith.select %13, %15, %4 : vector<1x32xi1>, vector<1x32xi32>
    %c-1_i32 = arith.constant -1 : i32
    %17 = vector.broadcast %c-1_i32 : i32 to vector<1x32xi32>
    %18 = arith.addi %16, %17 : vector<1x32xi32>
    %c0_i32_3 = arith.constant 0 : i32
    %19 = vector.broadcast %c0_i32_3 : i32 to vector<1x32xi32>
    %20 = arith.cmpi sge, %18, %19 : vector<1x32xi32>
    %c-1_i32_4 = arith.constant -1 : i32
    %21 = vector.broadcast %c-1_i32_4 : i32 to vector<1x32xi32>
    %22 = arith.addi %16, %21 : vector<1x32xi32>
    %c16_i32_5 = arith.constant 16 : i32
    %23 = vector.broadcast %c16_i32_5 : i32 to vector<1x32xi32>
    %24 = arith.cmpi slt, %22, %23 : vector<1x32xi32>
    %25 = arith.andi %20, %24 : vector<1x32xi1>
    %c1_i32_6 = arith.constant 1 : i32
    %26 = vector.broadcast %c1_i32_6 : i32 to vector<1x32xi32>
    %27 = arith.addi %16, %26 : vector<1x32xi32>
    %c0_i32_7 = arith.constant 0 : i32
    %28 = vector.broadcast %c0_i32_7 : i32 to vector<1x32xi32>
    %29 = arith.cmpi sge, %27, %28 : vector<1x32xi32>
    %c1_i32_8 = arith.constant 1 : i32
    %30 = vector.broadcast %c1_i32_8 : i32 to vector<1x32xi32>
    %31 = arith.addi %16, %30 : vector<1x32xi32>
    %c16_i32_9 = arith.constant 16 : i32
    %32 = vector.broadcast %c16_i32_9 : i32 to vector<1x32xi32>
    %33 = arith.cmpi slt, %31, %32 : vector<1x32xi32>
    %34 = arith.andi %29, %33 : vector<1x32xi1>
    %c0 = arith.constant 0 : index
    %c0_10 = arith.constant 0 : index
    %35 = vector.load %arg1[%c0, %c0_10] : memref<8x32xf32, #tpu.memory_space<vmem>>, vector<8x32xf32>
    %c0_11 = arith.constant 0 : index
    %c0_12 = arith.constant 0 : index
    %36 = vector.load %arg3[%c0_11, %c0_12] : memref<32x1xf32, #tpu.memory_space<vmem>>, vector<32x1xf32>
    %c0_13 = arith.constant 0 : index
    %c1 = arith.constant 1 : index
    %37 = vector.load %arg9[%c0_13, %c1] : memref<32x34xf32, #tpu.memory_space<vmem>>, vector<8x32xf32>
    tpu.vector_store %arg9[%c0_13, %c1], %35 {strides = array<i32>} : memref<32x34xf32, #tpu.memory_space<vmem>>, vector<8x32xf32>,
    %c0_14 = arith.constant 0 : index
    %c0_15 = arith.constant 0 : index
    %38 = vector.load %arg9[%c0_14, %c0_15] : memref<32x34xf32, #tpu.memory_space<vmem>>, vector<8x32xf32>
    %cst = arith.constant 0.000000e+00 : f32
    %39 = vector.broadcast %cst : f32 to vector<8x32xf32>
    %40 = vector.shape_cast %25 : vector<1x32xi1> to vector<1x32xi1>
    %41 = vector.broadcast %40 : vector<1x32xi1> to vector<8x32xi1>
    %42 = arith.select %41, %38, %39 : vector<8x32xi1>, vector<8x32xf32>
    %c0_16 = arith.constant 0 : index
    %c0_17 = arith.constant 0 : index
    %c0_18 = arith.constant 0 : index
    %43 = vector.load %arg2[%c0_16, %c0_17, %c0_18] : memref<3x32x8xf32, #tpu.memory_space<vmem>>, vector<1x32x8xf32>
    %44 = vector.shape_cast %43 : vector<1x32x8xf32> to vector<32x8xf32>
    %cst_19 = arith.constant dense<0.000000e+00> : vector<32x32xf32>
    %45 = tpu.matmul %44, %42, %cst_19 {dimension_numbers = #tpu.dot_dimension_numbers<[1], [0], [0], [1], [0, 0, 1, 1], [], []>} : vector<32x8xf32>, vector<8x32xf32>, vector<32x32xf32> -> vector<32x32xf32>
    %c0_20 = arith.constant 0 : index
    %c1_21 = arith.constant 1 : index
    %46 = vector.load %arg9[%c0_20, %c1_21] : memref<32x34xf32, #tpu.memory_space<vmem>>, vector<8x32xf32>
    %c1_22 = arith.constant 1 : index
    %c0_23 = arith.constant 0 : index
    %c0_24 = arith.constant 0 : index
    %47 = vector.load %arg2[%c1_22, %c0_23, %c0_24] : memref<3x32x8xf32, #tpu.memory_space<vmem>>, vector<1x32x8xf32>
    %48 = vector.shape_cast %47 : vector<1x32x8xf32> to vector<32x8xf32>
    %cst_25 = arith.constant dense<0.000000e+00> : vector<32x32xf32>
    %49 = tpu.matmul %48, %46, %cst_25 {dimension_numbers = #tpu.dot_dimension_numbers<[1], [0], [0], [1], [0, 0, 1, 1], [], []>} : vector<32x8xf32>, vector<8x32xf32>, vector<32x32xf32> -> vector<32x32xf32>
    %50 = arith.addf %45, %49 : vector<32x32xf32>
    %c0_26 = arith.constant 0 : index
    %c2 = arith.constant 2 : index
    %51 = vector.load %arg9[%c0_26, %c2] : memref<32x34xf32, #tpu.memory_space<vmem>>, vector<8x32xf32>
    %cst_27 = arith.constant 0.000000e+00 : f32
    %52 = vector.broadcast %cst_27 : f32 to vector<8x32xf32>
    %53 = vector.shape_cast %34 : vector<1x32xi1> to vector<1x32xi1>
    %54 = vector.broadcast %53 : vector<1x32xi1> to vector<8x32xi1>
    %55 = arith.select %54, %51, %52 : vector<8x32xi1>, vector<8x32xf32>
    %c2_28 = arith.constant 2 : index
    %c0_29 = arith.constant 0 : index
    %c0_30 = arith.constant 0 : index
    %56 = vector.load %arg2[%c2_28, %c0_29, %c0_30] : memref<3x32x8xf32, #tpu.memory_space<vmem>>, vector<1x32x8xf32>
    %57 = vector.shape_cast %56 : vector<1x32x8xf32> to vector<32x8xf32>
    %cst_31 = arith.constant dense<0.000000e+00> : vector<32x32xf32>
    %58 = tpu.matmul %57, %55, %cst_31 {dimension_numbers = #tpu.dot_dimension_numbers<[1], [0], [0], [1], [0, 0, 1, 1], [], []>} : vector<32x8xf32>, vector<8x32xf32>, vector<32x32xf32> -> vector<32x32xf32>
    %59 = arith.addf %50, %58 : vector<32x32xf32>
    %60 = vector.broadcast %36 : vector<32x1xf32> to vector<32x32xf32>
    %61 = arith.addf %59, %60 : vector<32x32xf32>
    %cst_32 = arith.constant 0.000000e+00 : f32
    %62 = vector.broadcast %cst_32 : f32 to vector<32x32xf32>
    %63 = arith.maximumf %61, %62 : vector<32x32xf32>
    %c0_33 = arith.constant 0 : index
    %c0_34 = arith.constant 0 : index
    %64 = vector.load %arg5[%c0_33, %c0_34] : memref<16x1xf32, #tpu.memory_space<vmem>>, vector<16x1xf32>
    %c0_35 = arith.constant 0 : index
    %c1_36 = arith.constant 1 : index
    %65 = vector.load %arg9[%c0_35, %c1_36] : memref<32x34xf32, #tpu.memory_space<vmem>>, vector<32x32xf32>
    tpu.vector_store %arg9[%c0_35, %c1_36], %63 {strides = array<i32>} : memref<32x34xf32, #tpu.memory_space<vmem>>, vector<32x32xf32>,
    %c0_37 = arith.constant 0 : index
    %c0_38 = arith.constant 0 : index
    %66 = vector.load %arg9[%c0_37, %c0_38] : memref<32x34xf32, #tpu.memory_space<vmem>>, vector<32x32xf32>
    %cst_39 = arith.constant 0.000000e+00 : f32
    %67 = vector.broadcast %cst_39 : f32 to vector<32x32xf32>
    %68 = vector.shape_cast %25 : vector<1x32xi1> to vector<1x32xi1>
    %69 = vector.broadcast %68 : vector<1x32xi1> to vector<32x32xi1>
    %70 = arith.select %69, %66, %67 : vector<32x32xi1>, vector<32x32xf32>
    %c0_40 = arith.constant 0 : index
    %c0_41 = arith.constant 0 : index
    %c0_42 = arith.constant 0 : index
    %71 = vector.load %arg4[%c0_40, %c0_41, %c0_42] : memref<3x16x32xf32, #tpu.memory_space<vmem>>, vector<1x16x32xf32>
    %72 = vector.shape_cast %71 : vector<1x16x32xf32> to vector<16x32xf32>
    %cst_43 = arith.constant dense<0.000000e+00> : vector<16x32xf32>
    %73 = tpu.matmul %72, %70, %cst_43 {dimension_numbers = #tpu.dot_dimension_numbers<[1], [0], [0], [1], [0, 0, 1, 1], [], []>} : vector<16x32xf32>, vector<32x32xf32>, vector<16x32xf32> -> vector<16x32xf32>
    %c0_44 = arith.constant 0 : index
    %c1_45 = arith.constant 1 : index
    %74 = vector.load %arg9[%c0_44, %c1_45] : memref<32x34xf32, #tpu.memory_space<vmem>>, vector<32x32xf32>
    %c1_46 = arith.constant 1 : index
    %c0_47 = arith.constant 0 : index
    %c0_48 = arith.constant 0 : index
    %75 = vector.load %arg4[%c1_46, %c0_47, %c0_48] : memref<3x16x32xf32, #tpu.memory_space<vmem>>, vector<1x16x32xf32>
    %76 = vector.shape_cast %75 : vector<1x16x32xf32> to vector<16x32xf32>
    %cst_49 = arith.constant dense<0.000000e+00> : vector<16x32xf32>
    %77 = tpu.matmul %76, %74, %cst_49 {dimension_numbers = #tpu.dot_dimension_numbers<[1], [0], [0], [1], [0, 0, 1, 1], [], []>} : vector<16x32xf32>, vector<32x32xf32>, vector<16x32xf32> -> vector<16x32xf32>
    %78 = arith.addf %73, %77 : vector<16x32xf32>
    %c0_50 = arith.constant 0 : index
    %c2_51 = arith.constant 2 : index
    %79 = vector.load %arg9[%c0_50, %c2_51] : memref<32x34xf32, #tpu.memory_space<vmem>>, vector<32x32xf32>
    %cst_52 = arith.constant 0.000000e+00 : f32
    %80 = vector.broadcast %cst_52 : f32 to vector<32x32xf32>
    %81 = vector.shape_cast %34 : vector<1x32xi1> to vector<1x32xi1>
    %82 = vector.broadcast %81 : vector<1x32xi1> to vector<32x32xi1>
    %83 = arith.select %82, %79, %80 : vector<32x32xi1>, vector<32x32xf32>
    %c2_53 = arith.constant 2 : index
    %c0_54 = arith.constant 0 : index
    %c0_55 = arith.constant 0 : index
    %84 = vector.load %arg4[%c2_53, %c0_54, %c0_55] : memref<3x16x32xf32, #tpu.memory_space<vmem>>, vector<1x16x32xf32>
    %85 = vector.shape_cast %84 : vector<1x16x32xf32> to vector<16x32xf32>
    %cst_56 = arith.constant dense<0.000000e+00> : vector<16x32xf32>
    %86 = tpu.matmul %85, %83, %cst_56 {dimension_numbers = #tpu.dot_dimension_numbers<[1], [0], [0], [1], [0, 0, 1, 1], [], []>} : vector<16x32xf32>, vector<32x32xf32>, vector<16x32xf32> -> vector<16x32xf32>
    %87 = arith.addf %78, %86 : vector<16x32xf32>
    %88 = vector.broadcast %64 : vector<16x1xf32> to vector<16x32xf32>
    %89 = arith.addf %87, %88 : vector<16x32xf32>
    %cst_57 = arith.constant 0.000000e+00 : f32
    %90 = vector.broadcast %cst_57 : f32 to vector<16x32xf32>
    %91 = arith.maximumf %89, %90 : vector<16x32xf32>
    %c0_58 = arith.constant 0 : index
    %c0_59 = arith.constant 0 : index
    %92 = vector.load %arg7[%c0_58, %c0_59] : memref<6x1xf32, #tpu.memory_space<vmem>>, vector<6x1xf32>
    %c0_60 = arith.constant 0 : index
    %c1_61 = arith.constant 1 : index
    %93 = vector.load %arg9[%c0_60, %c1_61] : memref<32x34xf32, #tpu.memory_space<vmem>>, vector<16x32xf32>
    tpu.vector_store %arg9[%c0_60, %c1_61], %91 {strides = array<i32>} : memref<32x34xf32, #tpu.memory_space<vmem>>, vector<16x32xf32>,
    %c0_62 = arith.constant 0 : index
    %c0_63 = arith.constant 0 : index
    %94 = vector.load %arg9[%c0_62, %c0_63] : memref<32x34xf32, #tpu.memory_space<vmem>>, vector<16x32xf32>
    %cst_64 = arith.constant 0.000000e+00 : f32
    %95 = vector.broadcast %cst_64 : f32 to vector<16x32xf32>
    %96 = vector.shape_cast %25 : vector<1x32xi1> to vector<1x32xi1>
    %97 = vector.broadcast %96 : vector<1x32xi1> to vector<16x32xi1>
    %98 = arith.select %97, %94, %95 : vector<16x32xi1>, vector<16x32xf32>
    %c0_65 = arith.constant 0 : index
    %c0_66 = arith.constant 0 : index
    %c0_67 = arith.constant 0 : index
    %99 = vector.load %arg6[%c0_65, %c0_66, %c0_67] : memref<3x6x16xf32, #tpu.memory_space<vmem>>, vector<1x6x16xf32>
    %100 = vector.shape_cast %99 : vector<1x6x16xf32> to vector<6x16xf32>
    %cst_68 = arith.constant dense<0.000000e+00> : vector<6x32xf32>
    %101 = tpu.matmul %100, %98, %cst_68 {dimension_numbers = #tpu.dot_dimension_numbers<[1], [0], [0], [1], [0, 0, 1, 1], [], []>} : vector<6x16xf32>, vector<16x32xf32>, vector<6x32xf32> -> vector<6x32xf32>
    %c0_69 = arith.constant 0 : index
    %c1_70 = arith.constant 1 : index
    %102 = vector.load %arg9[%c0_69, %c1_70] : memref<32x34xf32, #tpu.memory_space<vmem>>, vector<16x32xf32>
    %c1_71 = arith.constant 1 : index
    %c0_72 = arith.constant 0 : index
    %c0_73 = arith.constant 0 : index
    %103 = vector.load %arg6[%c1_71, %c0_72, %c0_73] : memref<3x6x16xf32, #tpu.memory_space<vmem>>, vector<1x6x16xf32>
    %104 = vector.shape_cast %103 : vector<1x6x16xf32> to vector<6x16xf32>
    %cst_74 = arith.constant dense<0.000000e+00> : vector<6x32xf32>
    %105 = tpu.matmul %104, %102, %cst_74 {dimension_numbers = #tpu.dot_dimension_numbers<[1], [0], [0], [1], [0, 0, 1, 1], [], []>} : vector<6x16xf32>, vector<16x32xf32>, vector<6x32xf32> -> vector<6x32xf32>
    %106 = arith.addf %101, %105 : vector<6x32xf32>
    %c0_75 = arith.constant 0 : index
    %c2_76 = arith.constant 2 : index
    %107 = vector.load %arg9[%c0_75, %c2_76] : memref<32x34xf32, #tpu.memory_space<vmem>>, vector<16x32xf32>
    %cst_77 = arith.constant 0.000000e+00 : f32
    %108 = vector.broadcast %cst_77 : f32 to vector<16x32xf32>
    %109 = vector.shape_cast %34 : vector<1x32xi1> to vector<1x32xi1>
    %110 = vector.broadcast %109 : vector<1x32xi1> to vector<16x32xi1>
    %111 = arith.select %110, %107, %108 : vector<16x32xi1>, vector<16x32xf32>
    %c2_78 = arith.constant 2 : index
    %c0_79 = arith.constant 0 : index
    %c0_80 = arith.constant 0 : index
    %112 = vector.load %arg6[%c2_78, %c0_79, %c0_80] : memref<3x6x16xf32, #tpu.memory_space<vmem>>, vector<1x6x16xf32>
    %113 = vector.shape_cast %112 : vector<1x6x16xf32> to vector<6x16xf32>
    %cst_81 = arith.constant dense<0.000000e+00> : vector<6x32xf32>
    %114 = tpu.matmul %113, %111, %cst_81 {dimension_numbers = #tpu.dot_dimension_numbers<[1], [0], [0], [1], [0, 0, 1, 1], [], []>} : vector<6x16xf32>, vector<16x32xf32>, vector<6x32xf32> -> vector<6x32xf32>
    %115 = arith.addf %106, %114 : vector<6x32xf32>
    %116 = vector.broadcast %92 : vector<6x1xf32> to vector<6x32xf32>
    %117 = arith.addf %115, %116 : vector<6x32xf32>
    %c0_82 = arith.constant 0 : index
    %c0_83 = arith.constant 0 : index
    %118 = vector.load %arg8[%c0_82, %c0_83] : memref<6x32xf32, #tpu.memory_space<vmem>>, vector<6x32xf32>
    tpu.vector_store %arg8[%c0_82, %c0_83], %117 {strides = array<i32>} : memref<6x32xf32, #tpu.memory_space<vmem>>, vector<6x32xf32>,
    return
  }
  func.func @transform_0(%arg0: i32) -> (i32, i32) {
    %c0_i32 = arith.constant 0 : i32
    %c0_i32_0 = arith.constant 0 : i32
    return %c0_i32, %arg0 : i32, i32
  }
  func.func @transform_1(%arg0: i32) -> (i32, i32, i32) {
    %c0_i32 = arith.constant 0 : i32
    %c0_i32_0 = arith.constant 0 : i32
    %c0_i32_1 = arith.constant 0 : i32
    %c0_i32_2 = arith.constant 0 : i32
    return %c0_i32, %c0_i32_0, %c0_i32_1 : i32, i32, i32
  }
  func.func @transform_2(%arg0: i32) -> (i32, i32) {
    %c0_i32 = arith.constant 0 : i32
    %c0_i32_0 = arith.constant 0 : i32
    %c0_i32_1 = arith.constant 0 : i32
    return %c0_i32, %c0_i32_0 : i32, i32
  }
  func.func @transform_3(%arg0: i32) -> (i32, i32, i32) {
    %c0_i32 = arith.constant 0 : i32
    %c0_i32_0 = arith.constant 0 : i32
    %c0_i32_1 = arith.constant 0 : i32
    %c0_i32_2 = arith.constant 0 : i32
    return %c0_i32, %c0_i32_0, %c0_i32_1 : i32, i32, i32
  }
  func.func @transform_4(%arg0: i32) -> (i32, i32) {
    %c0_i32 = arith.constant 0 : i32
    %c0_i32_0 = arith.constant 0 : i32
    %c0_i32_1 = arith.constant 0 : i32
    return %c0_i32, %c0_i32_0 : i32, i32
  }
  func.func @transform_5(%arg0: i32) -> (i32, i32, i32) {
    %c0_i32 = arith.constant 0 : i32
    %c0_i32_0 = arith.constant 0 : i32
    %c0_i32_1 = arith.constant 0 : i32
    %c0_i32_2 = arith.constant 0 : i32
    return %c0_i32, %c0_i32_0, %c0_i32_1 : i32, i32, i32
  }
  func.func @transform_6(%arg0: i32) -> (i32, i32) {
    %c0_i32 = arith.constant 0 : i32
    %c0_i32_0 = arith.constant 0 : i32
    %c0_i32_1 = arith.constant 0 : i32
    return %c0_i32, %c0_i32_0 : i32, i32
  }
  func.func @transform_7(%arg0: i32) -> (i32, i32) {
    %c0_i32 = arith.constant 0 : i32
    %c0_i32_0 = arith.constant 0 : i32
    return %c0_i32, %arg0 : i32, i32
  }
}

</mosaic_0001>

<bundles_post_ra>
// kernel: tpu_custom_call.1
= control target key start
LH: loop header
LB: loop body
LE: loop exit
PB: predicated region body
PF: predicated region fallthrough
CT: control target
= control target key end

     0   :  { %s1464_s0 = inlined_call_operand.vmem [shape: f32[8,32], index: 0, kind: input, shape index: {}]   ;;  %s1465_s1 = inlined_call_operand.vmem [shape: f32[3,32,8], index: 1, kind: input, shape index: {}]   ;;  %s1466_s2 = inlined_call_operand.vmem [shape: f32[32,1], index: 2, kind: input, shape index: {}]   ;;  %s1467_s3 = inlined_call_operand.vmem [shape: f32[3,16,32], index: 3, kind: input, shape index: {}]   ;;  %s1468_s4 = inlined_call_operand.vmem [shape: f32[16,1], index: 4, kind: input, shape index: {}]   ;;  %s1469_s5 = inlined_call_operand.vmem [shape: f32[3,6,16], index: 5, kind: input, shape index: {}]   ;;  %s1470_s6 = inlined_call_operand.vmem [shape: f32[6,1], index: 6, kind: input, shape index: {}]   ;;  %s1471_s7 = inlined_call_operand.hbm [shape: f32[6,32], index: 7, kind: output, shape index: {}]  }
   0x1   :  { %v49_v0 = vld [vmem:[%s1464_s0] sm:$0xff] }
   0x2   :  { %12 = vsyncpa [#allocation4], 0  ;;  %s1221_s26 = smov 1   ;;  %v27_v1 = vlaneseq  ;;  %v1021_v3 = vld [vmem:[%s1465_s1 + $0x20] sm:$0xff]  ;;  %vm77_vm0 = vcmask 64512   ;;  %vm58_vm1 = vcmask 269320  }
   0x3   :  { %55 = vrot.lane.b32.xlu0 %v49_v0, %s1221_s26  ;;  %v64_v4 = vld [vmem:[%s1465_s1] sm:$0xff]  ;;  %1114 = vmatprep.mubr.msk.f32.mxu0 %vm77_vm0, %v1021_v3  ;;  %s1222_s0 = smov 126   ;;  %s1223_s8 = smov 127   ;;  %v65_v9 = vld [vmem:[%s1465_s1 + $0x8] sm:$0xff]  ;;  %v66_v10 = vld [vmem:[%s1465_s1 + $0x10] sm:$0xff]  ;;  %v1224_v12 = vmov 0  }
   0x4   :  { %v28_v2 = vand.u32 127, %v27_v1  ;;  %1122 = vmatprep.mubr.msk.f32.mxu1 %vm77_vm0, %v64_v4  ;;  %v53_v11 = vld [vmem:[%s1466_s2 + $0x18] sm:$0xff]  ;;  %1197 = vset.pattern.permute.xlu1 %v1224_v12  ;;  %v52_v13 = vld [vmem:[%s1466_s2 + $0x10] sm:$0xff]  ;;  %v51_v15 = vld [vmem:[%s1466_s2 + $0x8] sm:$0xff]  ;;  %vm463_vm4 = vcmask 261120   ;;  %vm1226_vm5 = vmmov 0  }
   0x5   :  { %1198 = vset.pattern.permute.xlu0 %v1224_v12  ;;  %v67_v14 = vld [vmem:[%s1465_s1 + $0x18] sm:$0xff]  ;;  %v50_v16 = vld [vmem:[%s1466_s2] sm:$0xff]  ;;  %v1022_v19 = vld [vmem:[%s1465_s1 + $0x28] sm:$0xff]  ;;  %vm768_vm6 = vcmask 130048   ;;  %vm1005_vm7 = vcmask 259072  }
   0x6   :  { %v33_v5 = vand.u32 15, %v28_v2  ;;  %v1023_v20 = vld [vmem:[%s1465_s1 + $0x30] sm:$0xff]  ;;  %v1024_v22 = vld [vmem:[%s1465_s1 + $0x38] sm:$0xff]  ;;  %v1034_v23 = vld [vmem:[%s1465_s1 + $0x40] sm:$0xff] }
   0x7   :  { %v1035_v24 = vld [vmem:[%s1465_s1 + $0x48] sm:$0xff]  ;;  %v1036_v25 = vld [vmem:[%s1465_s1 + $0x50] sm:$0xff]  ;;  %v1037_v26 = vld [vmem:[%s1465_s1 + $0x58] sm:$0xff] }
   0x8   :  { %v1281_v7 = vadd.s32 4294967295, %v33_v5  ;;  %v1314_v17 = vadd.s32 1, %v33_v5  ;;  %v1043_v61 = vld [vmem:[%s1467_s3 + $0x10] sm:$0xff]  ;;  %v442_v62 = vld [vmem:[%s1467_s3] sm:$0xff]  ;;  %v443_v5 = vld [vmem:[%s1467_s3 + $0x8] sm:$0xff] }
   0xa   :  { %vm42_vm2 = vcmp.ge.s32.totalorder %v1281_v7, 0  ;;  %vm47_vm3 = vcmp.lt.s32.totalorder %v1314_v17, 16 }
  0x75   :  { %v56_v6 = vpop.permute.xlu0 %55 }
  0x76   :  { %59 = vst.msk [vmem:[#allocation2] sm:$0xff] %vm58_vm1, %v56_v6  ;;  %v413_v6 = vld [vmem:[%s1468_s4 + $0x8] sm:$0xff] }
  0x7d   :  { %v60_v8 = vld [vmem:[#allocation2] sm:$0xff] }
  0x7e   :  { %274 = vrot.lane.b32.xlu1 %v60_v8, %s1222_s0  ;;  %74 = vrot.lane.b32.xlu0 %v60_v8, %s1223_s8 }
  0x7f   :  { %1120 = vmatprep.subr.msk.mxu1 %vm42_vm2, %v60_v8 }
  0x80   :  { %1121 = vmatpush3.msk.msra.mxu1 %vm42_vm2, %v60_v8  ;;  %v412_v8 = vld [vmem:[%s1468_s4] sm:$0xff] }
  0x81   :  { %1123 = vmatmul.mubr.msk.f32.vlgmr.msra.gmra.mxu1 %vm77_vm0, %v65_v9 }
  0x82   :  { %1125 = vmatprep.mubr.msk.f32.mxu1 %vm77_vm0, %v66_v10  ;;  %401 = vperm.xlu1 %1197, %v53_v11  }
  0x83   :  { %396 = vperm.xlu0 %1198, %v52_v13   ;;  %v1044_v13 = vld [vmem:[%s1467_s3 + $0x18] sm:$0xff] }
  0x85   :  { %1126 = vmatmul.mubr.msk.f32.gmra.mxu1 %vm77_vm0, %v67_v14  ;;  %v1053_v14 = vld [vmem:[%s1467_s3 + $0x20] sm:$0xff] }
  0x86   :  { %391 = vperm.xlu1 %1197, %v51_v15   ;;  %1144 = vmatprep.mubr.msk.f32.mxu1 %vm463_vm4, %v1043_v61 }
  0x8a   :  { %386 = vperm.xlu1 %1197, %v50_v16  }
  0xf0   :  { %v75_v18 = vpop.permute.xlu0 %74  ;;  %v275_v21 = vpop.permute.xlu1 %274 }
  0xf1   :  { %1112 = vmatprep.subr.mxu0 %v75_v18 }
  0xf2   :  { %1113 = vmatpush3.msra.mxu0 %v75_v18 }
  0xf3   :  { %1115 = vmatmul.mubr.msk.f32.vlgmr.msra.gmra.mxu0 %vm77_vm0, %v1022_v19  ;;  %1128 = vmatprep.subr.msk.mxu0 %vm47_vm3, %v275_v21 }
  0xf4   :  { %1129 = vmatpush3.msk.msra.mxu0 %vm47_vm3, %v275_v21  ;;  %1117 = vmatprep.mubr.msk.f32.mxu0 %vm77_vm0, %v1023_v20  ;;  %v1054_v20 = vld [vmem:[%s1467_s3 + $0x28] sm:$0xff] }
  0xf7   :  { %1118 = vmatmul.mubr.msk.f32.gmra.mxu0 %vm77_vm0, %v1024_v22 }
  0xf8   :  { %1130 = vmatprep.mubr.msk.f32.mxu0 %vm77_vm0, %v1034_v23  ;;  %v1225_v23 = vmov 0.0  }
  0xfb   :  { %1131 = vmatmul.mubr.msk.f32.vlgmr.msra.gmra.mxu0 %vm77_vm0, %v1035_v24 }
  0xfc   :  { %1133 = vmatprep.mubr.msk.f32.mxu0 %vm77_vm0, %v1036_v25 }
  0xfd   :  { %v402_v31 = vpop.permute.xlu1 %401 }
  0xfe   :  { %v397_v47 = vpop.permute.xlu0 %396 }
  0xff   :  { %1134 = vmatmul.mubr.msk.f32.gmra.mxu0 %vm77_vm0, %v1037_v26 }
 0x100   :  { %1155 = vmatprep.mubr.msk.f32.mxu0 %vm463_vm4, %v442_v62 }
 0x101   :  { %v392_v36 = vpop.permute.xlu1 %391 }
 0x105   :  { %v387_v51 = vpop.permute.xlu1 %386 }
 0x141   :  { %v1124_v27 = vpop.f32.mrf.mxu1 }
 0x143   :  { %v253_v30 = vpop.f32.mrf.mxu1 }
 0x145   :  { %v1127_v33 = vpop.f32.mrf.mxu1 }
 0x147   :  { %v263_v37 = vpop.f32.mrf.mxu1 }
 0x1b3   :  { %v1116_v28 = vpop.f32.mrf.mxu0 }
 0x1b4   :  { %v259_v39 = vadd.f32 %v1124_v27, %v1116_v28 }
 0x1b5   :  { %v156_v29 = vpop.f32.mrf.mxu0 }
 0x1b6   :  { %v254_v42 = vadd.f32 %v253_v30, %v156_v29 }
 0x1b7   :  { %v1119_v32 = vpop.f32.mrf.mxu0 }
 0x1b8   :  { %v269_v40 = vadd.f32 %v1127_v33, %v1119_v32 }
 0x1b9   :  { %v166_v34 = vpop.f32.mrf.mxu0 }
 0x1ba   :  { %v264_v43 = vadd.f32 %v263_v37, %v166_v34 }
 0x1bb   :  { %v1132_v35 = vpop.f32.mrf.mxu0 }
 0x1bc   :  { %v381_v44 = vadd.f32 %v1132_v35, %v259_v39 }
 0x1bd   :  { %v361_v38 = vpop.f32.mrf.mxu0 }
 0x1be   :  { %v380_v48 = vadd.f32 %v361_v38, %v254_v42  ;;  %v405_v52 = vadd.f32 %v392_v36, %v381_v44 }
 0x1bf   :  { %v1135_v41 = vpop.f32.mrf.mxu0 }
 0x1c0   :  { %v383_v45 = vadd.f32 %v1135_v41, %v269_v40  ;;  %v404_v55 = vadd.f32 %v387_v51, %v380_v48  ;;  %v409_v57 = vmax.f32 %v405_v52, 0.0  ;;  %v757_v41 = vld [vmem:[%s1469_s5] sm:$0x3f] }
 0x1c1   :  { %v371_v46 = vpop.f32.mrf.mxu0 }
 0x1c2   :  { %v407_v49 = vadd.f32 %v402_v31, %v383_v45  ;;  %v382_v50 = vadd.f32 %v371_v46, %v264_v43  ;;  %v408_v58 = vmax.f32 %v404_v55, 0.0  ;;  %v742_v43 = vld [vmem:[%s1470_s6] sm:$0x3f]  ;;  %v1061_v45 = vld [vmem:[%s1469_s5 + $0x8] sm:$0x3f] }
 0x1c4   :  { %v411_v53 = vmax.f32 %v407_v49, 0.0  ;;  %v406_v54 = vadd.f32 %v397_v47, %v382_v50  ;;  %v1066_v47 = vld [vmem:[%s1469_s5 + $0x10] sm:$0x3f] }
 0x1c6   :  { %v410_v56 = vmax.f32 %v406_v54, 0.0  ;;  %424 = vrot.lane.b32.xlu0 %v411_v53, %s1221_s26 }
 0x1c8   :  { %422 = vrot.lane.b32.xlu1 %v410_v56, %s1221_s26 }
 0x1ca   :  { %420 = vrot.lane.b32.xlu0 %v409_v57, %s1221_s26 }
 0x1cc   :  { %418 = vrot.lane.b32.xlu1 %v408_v58, %s1221_s26 }
 0x238   :  { %v425_v59 = vpop.permute.xlu0 %424 }
 0x239   :  { %433 = vst.msk [vmem:[#allocation2 + $0x18] sm:$0xff] %vm58_vm1, %v425_v59 }
 0x23a   :  { %v423_v60 = vpop.permute.xlu1 %422 }
 0x23b   :  { %432 = vst.msk [vmem:[#allocation2 + $0x10] sm:$0xff] %vm58_vm1, %v423_v60 }
 0x23c   :  { %v421_v63 = vpop.permute.xlu0 %420 }
 0x23d   :  { %431 = vst.msk [vmem:[#allocation2 + $0x8] sm:$0xff] %vm58_vm1, %v421_v63 }
 0x23e   :  { %v419_v0 = vpop.permute.xlu1 %418 }
 0x23f   :  { %430 = vst.msk [vmem:[#allocation2] sm:$0xff] %vm58_vm1, %v419_v0 }
 0x240   :  { %v437_v1 = vld [vmem:[#allocation2 + $0x18] sm:$0xff] }
 0x241   :  { %457 = vrot.lane.b32.xlu0 %v437_v1, %s1223_s8  ;;  %1147 = vmatprep.subr.msk.mxu0 %vm42_vm2, %v437_v1 }
 0x242   :  { %1148 = vmatpush3.msk.msra.mxu0 %vm42_vm2, %v437_v1  ;;  %v436_v2 = vld [vmem:[#allocation2 + $0x10] sm:$0xff] }
 0x243   :  { %1149 = vmatprep.subr.msk.mxu0 %vm42_vm2, %v436_v2  ;;  %455 = vrot.lane.b32.xlu1 %v436_v2, %s1223_s8 }
 0x244   :  { %1150 = vmatpush3.msk.msra.mxu0 %vm42_vm2, %v436_v2  ;;  %v435_v3 = vld [vmem:[#allocation2 + $0x8] sm:$0xff] }
 0x245   :  { %453 = vrot.lane.b32.xlu0 %v435_v3, %s1223_s8  ;;  %1151 = vmatprep.subr.msk.mxu0 %vm42_vm2, %v435_v3 }
 0x246   :  { %1152 = vmatpush3.msk.msra.mxu0 %vm42_vm2, %v435_v3  ;;  %v434_v4 = vld [vmem:[#allocation2] sm:$0xff] }
 0x247   :  { %451 = vrot.lane.b32.xlu1 %v434_v4, %s1223_s8  ;;  %1153 = vmatprep.subr.msk.mxu0 %vm42_vm2, %v434_v4 }
 0x248   :  { %1154 = vmatpush3.msk.msra.mxu0 %vm42_vm2, %v434_v4 }
 0x249   :  { %632 = vrot.lane.b32.xlu0 %v437_v1, %s1222_s0  ;;  %1156 = vmatmul.mubr.msk.f32.vlgmr.msra.gmra.mxu0 %vm463_vm4, %v443_v5 }
 0x24a   :  { %1169 = vmatprep.subr.mxu0 %v1225_v23  ;;  %1173 = vmatprep.mubr.msk.f32.mxu0 %vm1226_vm5, %v1225_v23 }
 0x24b   :  { %630 = vrot.lane.b32.xlu1 %v436_v2, %s1222_s0 }
 0x24d   :  { %628 = vrot.lane.b32.xlu0 %v435_v3, %s1222_s0 }
 0x24f   :  { %626 = vrot.lane.b32.xlu1 %v434_v4, %s1222_s0 }
 0x251   :  { %735 = vperm.xlu0 %1198, %v413_v6  }
 0x253   :  { %730 = vperm.xlu1 %1197, %v412_v8  }
 0x2b3   :  { %v458_v9 = vpop.permute.xlu0 %457 }
 0x2b4   :  { %1136 = vmatprep.subr.mxu1 %v458_v9 }
 0x2b5   :  { %1137 = vmatpush3.msra.mxu1 %v458_v9  ;;  %v456_v10 = vpop.permute.xlu1 %455 }
 0x2b6   :  { %1138 = vmatprep.subr.mxu1 %v456_v10 }
 0x2b7   :  { %v454_v11 = vpop.permute.xlu0 %453  ;;  %1139 = vmatpush3.msra.mxu1 %v456_v10 }
 0x2b8   :  { %1140 = vmatprep.subr.mxu1 %v454_v11 }
 0x2b9   :  { %1141 = vmatpush3.msra.mxu1 %v454_v11  ;;  %v452_v12 = vpop.permute.xlu1 %451 }
 0x2ba   :  { %1142 = vmatprep.subr.mxu1 %v452_v12 }
 0x2bb   :  { %v633_v15 = vpop.permute.xlu0 %632  ;;  %1143 = vmatpush3.msra.mxu1 %v452_v12 }
 0x2bc   :  { %1145 = vmatmul.mubr.msk.f32.vlgmr.msra.gmra.mxu1 %vm463_vm4, %v1044_v13  ;;  %1158 = vmatprep.subr.msk.mxu1 %vm47_vm3, %v633_v15 }
 0x2bd   :  { %1159 = vmatpush3.msk.msra.mxu1 %vm47_vm3, %v633_v15  ;;  %v631_v16 = vpop.permute.xlu1 %630  ;;  %1166 = vmatprep.mubr.msk.f32.mxu1 %vm463_vm4, %v1053_v14 }
 0x2be   :  { %1160 = vmatprep.subr.msk.mxu1 %vm47_vm3, %v631_v16 }
 0x2bf   :  { %v629_v18 = vpop.permute.xlu0 %628  ;;  %1161 = vmatpush3.msk.msra.mxu1 %vm47_vm3, %v631_v16 }
 0x2c0   :  { %1162 = vmatprep.subr.msk.mxu1 %vm47_vm3, %v629_v18 }
 0x2c1   :  { %1163 = vmatpush3.msk.msra.mxu1 %vm47_vm3, %v629_v18  ;;  %v627_v19 = vpop.permute.xlu1 %626 }
 0x2c2   :  { %1164 = vmatprep.subr.msk.mxu1 %vm47_vm3, %v627_v19 }
 0x2c3   :  { %1165 = vmatpush3.msk.msra.mxu1 %vm47_vm3, %v627_v19 }
 0x2c4   :  { %1167 = vmatmul.mubr.msk.f32.vlgmr.msra.gmra.mxu1 %vm463_vm4, %v1054_v20  ;;  %1176 = vmatprep.subr.mxu1 %v1225_v23 }
 0x2c5   :  { %1180 = vmatprep.mubr.msk.f32.mxu1 %vm1226_vm5, %v1225_v23 }
 0x2cc   :  { %v736_v30 = vpop.permute.xlu0 %735 }
 0x2ce   :  { %v731_v34 = vpop.permute.xlu1 %730 }
 0x309   :  { %v1157_v22 = vpop.f32.mrf.mxu0 }
 0x30b   :  { %v617_v25 = vpop.f32.mrf.mxu0 }
 0x37c   :  { %v1146_v21 = vpop.f32.mrf.mxu1 }
 0x37d   :  { %v623_v26 = vadd.f32 %v1157_v22, %v1146_v21 }
 0x37e   :  { %v536_v24 = vpop.f32.mrf.mxu1 }
 0x37f   :  { %v618_v28 = vadd.f32 %v617_v25, %v536_v24 }
 0x384   :  { %v1168_v27 = vpop.f32.mrf.mxu1 }
 0x385   :  { %v727_v29 = vadd.f32 %v1168_v27, %v623_v26 }
 0x386   :  { %v717_v31 = vpop.f32.mrf.mxu1 }
 0x387   :  { %v739_v32 = vadd.f32 %v736_v30, %v727_v29  ;;  %v726_v33 = vadd.f32 %v717_v31, %v618_v28 }
 0x389   :  { %v741_v35 = vmax.f32 %v739_v32, 0.0  ;;  %v738_v36 = vadd.f32 %v731_v34, %v726_v33 }
 0x38b   :  { %v740_v37 = vmax.f32 %v738_v36, 0.0  ;;  %747 = vrot.lane.b32.xlu0 %v741_v35, %s1221_s26 }
 0x38d   :  { %745 = vrot.lane.b32.xlu1 %v740_v37, %s1221_s26 }
 0x3fd   :  { %v748_v38 = vpop.permute.xlu0 %747 }
 0x3fe   :  { %752 = vst.msk [vmem:[#allocation2 + $0x8] sm:$0xff] %vm58_vm1, %v748_v38 }
 0x3ff   :  { %v746_v39 = vpop.permute.xlu1 %745 }
 0x400   :  { %751 = vst.msk [vmem:[#allocation2] sm:$0xff] %vm58_vm1, %v746_v39 }
 0x405   :  { %v754_v40 = vld [vmem:[#allocation2 + $0x8] sm:$0xff] }
 0x406   :  { %764 = vrot.lane.b32.xlu0 %v754_v40, %s1223_s8  ;;  %1177 = vmatpush3.msk.msra.mxu1 %vm42_vm2, %v754_v40 }
 0x407   :  { %1178 = vmatprep.subr.mxu1 %v1225_v23  ;;  %v753_v42 = vld [vmem:[#allocation2] sm:$0xff] }
 0x408   :  { %762 = vrot.lane.b32.xlu1 %v753_v42, %s1223_s8  ;;  %1179 = vmatpush3.msk.msra.mxu1 %vm42_vm2, %v753_v42  ;;  %s1227_s8 = smov [#allocation3]  }
 0x409   :  { %1181 = vmatmul.mubr.msk.f32.vlgmr.msra.gmra.mxu1 %vm768_vm6, %v757_v41  ;;  %s1013_s11 = sshll.u32 %s1227_s8, 4  ;;  %s1014_s11 = int_to_ptr.vmem [resolvable:$true] %s1013_s11 }
 0x40a   :  { %917 = vrot.lane.b32.xlu0 %v754_v40, %s1222_s0  ;;  %s1199_s5 = scalar_lea.vmem %s1014_s11, 128  ;;  %p1204_p1 = scmp.lt.s32.totalorder %s1014_s11, %s1014_s11 }
 0x40b   :  { %p1200_p0 = scmp.ne.s32.totalorder %s1014_s11, %s1199_s5  ;;  %p1205_p2 = scmp.lt.s32.totalorder %s1199_s5, %s1199_s5 }
 0x40c   :  { %915 = vrot.lane.b32.xlu1 %v753_v42, %s1222_s0 }
 0x40d   :  { %p1206_p3 = por %p1205_p2, %p1204_p1 }
 0x40e   :  { %1001 = vperm.xlu0 %1198, %v742_v43  }
 0x40f   :  { %p1207_p4 = pnand %p1206_p3, %p1200_p0 }
 0x478   :  { %v765_v44 = vpop.permute.xlu0 %764 }
 0x479   :  { %1170 = vmatpush3.msra.mxu0 %v765_v44 }
 0x47a   :  { %1171 = vmatprep.subr.mxu0 %v1225_v23  ;;  %v763_v7 = vpop.permute.xlu1 %762 }
 0x47b   :  { %1172 = vmatpush3.msra.mxu0 %v763_v7 }
 0x47c   :  { %v918_v46 = vpop.permute.xlu0 %917  ;;  %1174 = vmatmul.mubr.msk.f32.vlgmr.msra.gmra.mxu0 %vm768_vm6, %v1061_v45  ;;  %1183 = vmatprep.subr.mxu0 %v1225_v23 }
 0x47d   :  { %1184 = vmatpush3.msk.msra.mxu0 %vm47_vm3, %v918_v46  ;;  %1187 = vmatprep.mubr.msk.f32.mxu0 %vm1226_vm5, %v1225_v23 }
 0x47e   :  { %1185 = vmatprep.subr.mxu0 %v1225_v23  ;;  %v916_v48 = vpop.permute.xlu1 %915 }
 0x47f   :  { %1186 = vmatpush3.msk.msra.mxu0 %vm47_vm3, %v916_v48 }
 0x480   :  { %1188 = vmatmul.mubr.msk.f32.vlgmr.msra.gmra.mxu0 %vm768_vm6, %v1066_v47 }
 0x489   :  { %v1002_v56 = vpop.permute.xlu0 %1001 }
 0x4c9   :  { %v911_v49 = vpop.f32.mrf.mxu1 }
 0x4cb   :  { %v1182_v50 = vpop.f32.mrf.mxu1 }
 0x53c   :  { %v838_v51 = vpop.f32.mrf.mxu0 }
 0x53d   :  { %v912_v53 = vadd.f32 %v911_v49, %v838_v51 }
 0x53e   :  { %v1175_v52 = vpop.f32.mrf.mxu0 }
 0x540   :  { %v994_v54 = vpop.f32.mrf.mxu0 }
 0x541   :  { %v998_v55 = vadd.f32 %v994_v54, %v912_v53 }
 0x542   :  { %v1189_v57 = vpop.f32.mrf.mxu0 }
 0x543   :  { %v1004_v58 = vadd.f32 %v1002_v56, %v998_v55 }
 0x545   :  { %1006 = vst.msk [vmem:[#allocation3] sm:$0x3f] %vm1005_vm7, %v1004_v58 }
 0x546   :  { %1210 = shalt.err (!%p1207_p4)
}
 0x547   :  { %1016 = dma.vmem_to_hbm [thread:$0]  %s1014_s11, 128, %s1471_s7, [#allocation4]  }
 0x548   :  { %1219 = dma.done.wait [#allocation4], 128  }
 0x549   :  { %1220 = vsyncadd [#allocation4], 4294967168 }
 0x54a   :  { %1020 = vsyncpa [#allocation4], 1 }

</bundles_post_ra>
